<compile_context>
chip_gen: v5e
topology: v5e:2x2
jax: 0.10.0
libtpu: 0.0.40
codegen_flags: <defaults>
</compile_context>

<pallas_src>
import jax
import jax.numpy as jnp
from jax.experimental import pallas as pl
from jax.experimental.pallas import tpu as pltpu
import numpy as np


def _make_kernel(true_hw, hw_tile):
    inv_hw = 1.0 / float(true_hw)
    n_cols = hw_tile // 128          # hw_tile is always a multiple of 128

    def kernel(x_ref, o_ref, acc_ref):
        k = pl.program_id(2)

        @pl.when(k == 0)
        def _init():
            acc_ref[...] = jnp.zeros_like(acc_ref)

        # ReLU + lane-preserving partial sums: only VPU adds in the hot loop.
        # Per-column slices keep live values small (no full-tile temporary).
        if n_cols <= 8:
            for j in range(n_cols):
                col = x_ref[:, j * 128:(j + 1) * 128]
                acc_ref[...] += jnp.maximum(col.astype(jnp.float32), 0.0)
        else:
            @pl.loop(0, n_cols)
            def _(j):
                start = pl.multiple_of(j * 128, 128)
                col = x_ref[:, pl.ds(start, 128)]
                acc_ref[...] += jnp.maximum(col.astype(jnp.float32), 0.0)

        @pl.when(k == pl.num_programs(2) - 1)
        def _finalize():
            # Single XLU cross-lane reduce, once per (split, row-block).
            pooled = jnp.sum(acc_ref[...], axis=-1, keepdims=True) * inv_hw
            o_ref[...] = pooled.astype(o_ref.dtype)

    return kernel


def _per_buffer_budget_bytes():
    # Per-generation input-tile budget (the input is double-buffered).
    try:
        kind = jax.devices()[0].device_kind.lower()
    except Exception:
        kind = ""
    if "v7" in kind:
        return 16 << 20       # 3.2 TB/s HBM -> bigger tiles amortize step cost
    if "v5 lite" in kind or "v5e" in kind or "v5litepod" in kind:
        return 6 << 20        # already ~93% of roofline at ~4-6 MiB
    return 8 << 20            # v6e and default


def _pick_rows_block(rows):
    """Divisor of `rows` that is a multiple of 8 (dense sublanes); prefer
    >= 2 row blocks when possible so a parallel grid axis can feed both
    v7x TensorCores."""
    if rows % 8 != 0:
        return rows                       # full extent (single block)
    cap = min(rows, 1024)
    if rows >= 16:
        cap = min(cap, rows // 2)
    cand = (cap // 8) * 8
    while cand >= 8 and rows % cand != 0:
        cand -= 8
    return cand if cand >= 8 else rows


def _pick_hw_tile(hw_pad, rows_block, itemsize, budget):
    """Largest multiple of 128 dividing hw_pad whose tile fits the budget."""
    max_tile = (budget // max(1, rows_block * itemsize)) // 128 * 128
    max_tile = max(128, max_tile)
    tile = min(hw_pad, max_tile)
    tile = (tile // 128) * 128
    while hw_pad % tile != 0:
        tile -= 128
    return tile


def layer1_forward(x_nchw, w_conv, w_lin, b_lin):
    """x_nchw: [B, Cin, H, W]; w_conv: [hidden, Cin, 1, 1];
    w_lin: [out, hidden]; b_lin: [out]  ->  returns [B, out] in x's dtype."""
    B, Cin, H, W = x_nchw.shape
    hidden = w_conv.shape[0]
    out_dim = w_lin.shape[0]
    HW = H * W
    rows = B * Cin

    # [B, Cin, H, W] -> [B*Cin, HW]: free, contiguous reshape of NCHW.
    x = x_nchw.reshape(rows, HW)

    # Pad the spatial axis to a multiple of 128 so every tile is lane-dense
    # (relu(0) == 0 keeps the sum exact; the mean divides by the true HW).
    HW_pad = ((HW + 127) // 128) * 128
    if HW_pad != HW:
        # TODO(synk): this pad is one extra HBM copy pass; an in-kernel iota
        # mask on the tail tile would avoid it when HW % 128 != 0.
        x = jnp.pad(x, ((0, 0), (0, HW_pad - HW)))

    RB = _pick_rows_block(rows)
    nb = rows // RB
    budget = _per_buffer_budget_bytes()
    HW_TILE = _pick_hw_tile(HW_pad, RB, x.dtype.itemsize, budget)
    nk = HW_pad // HW_TILE

    # If there is only one row block, split the spatial reduction into two
    # parallel halves so both v7x TensorCores get work (no-op on 1-TC chips).
    nsplit = 2 if (nb == 1 and nk >= 2 and nk % 2 == 0) else 1
    nk_per = nk // nsplit

    pooled_parts = pl.pallas_call(
        _make_kernel(HW, HW_TILE),
        out_shape=jax.ShapeDtypeStruct((nsplit, rows, 1), jnp.float32),
        grid=(nsplit, nb, nk_per),                   # reduction axis last
        in_specs=[
            pl.BlockSpec((RB, HW_TILE),
                         lambda c, r, k: (r, c * nk_per + k)),
        ],
        out_specs=pl.BlockSpec((None, RB, 1), lambda c, r, k: (c, r, 0)),
        scratch_shapes=[pltpu.VMEM((RB, 128), jnp.float32)],
        compiler_params=pltpu.CompilerParams(
            dimension_semantics=("parallel", "parallel", "arbitrary"),
            vmem_limit_bytes=48 << 20),
    )(x)

    # pooled mean of relu(x) over spatial, per (batch, channel).
    pooled = jnp.sum(pooled_parts, axis=0).reshape(B, Cin)       # [B, Cin]

    # Everything after the ReLU is linear -> pre-fuse 1x1-conv and linear:
    #   y = mean_s(relu(x)) @ (W_lin @ W_conv)^T + b     (tiny epilogue matmul)
    # TODO(synk): for repeated calls with static weights, hoist w_fused out of
    # the per-call path (precompute once).
    w_fused = jnp.transpose(
        w_lin.astype(jnp.float32) @ w_conv.reshape(hidden, Cin).astype(jnp.float32))
    y = pooled @ w_fused + b_lin.astype(jnp.float32)[None, :]    # [B, out]
    del out_dim
    return y.astype(x_nchw.dtype)


def layer1_reference(x_nchw, w_conv, w_lin, b_lin):
    """Pure-JAX reference of the intended forward (relu -> 1x1 conv -> global
    average pool -> linear)."""
    B, Cin, H, W = x_nchw.shape
    hidden = w_conv.shape[0]
    x = jnp.maximum(x_nchw.astype(jnp.float32), 0.0)
    h = jnp.einsum('bchw,oc->bohw', x,
                   w_conv.reshape(hidden, Cin).astype(jnp.float32))
    pooled = jnp.mean(h, axis=(2, 3))                             # [B, hidden]
    return pooled @ w_lin.astype(jnp.float32).T + b_lin.astype(jnp.float32)[None, :]


if __name__ == "__main__":
    B, inp, hidden, out = 2, 4, 32, 8
    H = W = 16

    key = jax.random.PRNGKey(0)
    kx, kc, kw, kb = jax.random.split(key, 4)

    x = jax.random.normal(kx, (B, inp, H, W), dtype=jnp.float32)
    # Deterministic parameter init (kaiming-ish scaling), no checkpoint load.
    w_conv = jax.random.normal(kc, (hidden, inp, 1, 1), jnp.float32) / np.sqrt(inp)
    w_lin = jax.random.normal(kw, (out, hidden), jnp.float32) / np.sqrt(hidden)
    b_lin = jax.random.normal(kb, (out,), jnp.float32) * 0.1

    fwd = jax.jit(layer1_forward)
    y = fwd(x, w_conv, w_lin, b_lin)
    jax.block_until_ready(y)

    y_ref = layer1_reference(x, w_conv, w_lin, b_lin)
    np.testing.assert_allclose(np.asarray(y), np.asarray(y_ref),
                               rtol=1e-5, atol=1e-5)
    assert y.shape == (B, out) and y.dtype == x.dtype

    print("KERNEL_OK")
</pallas_src>

<mosaic_0001>
module attributes {stable_mosaic.version = 11 : i64} {
  func.func @kernel(%arg0: i32, %arg1: i32, %arg2: i32, %arg3: memref<8x256xf32, #tpu.memory_space<vmem>>, %arg4: memref<1x8x1xf32, #tpu.memory_space<vmem>>, %arg5: memref<8x128xf32, #tpu.memory_space<vmem>>) attributes {dimension_semantics = [#tpu.dimension_semantics<parallel>, #tpu.dimension_semantics<parallel>, #tpu.dimension_semantics<arbitrary>], iteration_bounds = array<i64: 1, 1, 1>, scalar_prefetch = 0 : i64, scratch_operands = 1 : i64, tpu.core_type = #tpu.core_type<tc>, window_params = [{transform_indices = @transform_0, window_bounds = array<i64: 8, 256>}, {transform_indices = @transform_1, window_bounds = array<i64: 1, 8, 1>}]} {
    %c0_i32 = arith.constant 0 : i32
    %0 = arith.cmpi eq, %arg2, %c0_i32 : i32
    %1 = arith.extui %0 : i1 to i32
    %c0_i32_0 = arith.constant 0 : i32
    %2 = arith.cmpi ne, %1, %c0_i32_0 : i32
    scf.if %2 {
      %cst_14 = arith.constant 0.000000e+00 : f32
      %18 = vector.broadcast %cst_14 : f32 to vector<8x128xf32>
      %c0_15 = arith.constant 0 : index
      %c0_16 = arith.constant 0 : index
      %19 = vector.load %arg5[%c0_15, %c0_16] : memref<8x128xf32, #tpu.memory_space<vmem>>, vector<8x128xf32>
      tpu.vector_store %arg5[%c0_15, %c0_16], %18 {strides = array<i32>} : memref<8x128xf32, #tpu.memory_space<vmem>>, vector<8x128xf32>,
    } else {
    }
    %c0 = arith.constant 0 : index
    %c0_1 = arith.constant 0 : index
    %3 = vector.load %arg3[%c0, %c0_1] : memref<8x256xf32, #tpu.memory_space<vmem>>, vector<8x128xf32>
    %c0_2 = arith.constant 0 : index
    %c0_3 = arith.constant 0 : index
    %4 = vector.load %arg5[%c0_2, %c0_3] : memref<8x128xf32, #tpu.memory_space<vmem>>, vector<8x128xf32>
    %cst = arith.constant 0.000000e+00 : f32
    %5 = vector.broadcast %cst : f32 to vector<8x128xf32>
    %6 = arith.maximumf %3, %5 : vector<8x128xf32>
    %7 = arith.addf %4, %6 : vector<8x128xf32>
    %c0_4 = arith.constant 0 : index
    %c0_5 = arith.constant 0 : index
    %8 = vector.load %arg5[%c0_4, %c0_5] : memref<8x128xf32, #tpu.memory_space<vmem>>, vector<8x128xf32>
    tpu.vector_store %arg5[%c0_4, %c0_5], %7 {strides = array<i32>} : memref<8x128xf32, #tpu.memory_space<vmem>>, vector<8x128xf32>,
    %c0_6 = arith.constant 0 : index
    %c128 = arith.constant 128 : index
    %9 = vector.load %arg3[%c0_6, %c128] : memref<8x256xf32, #tpu.memory_space<vmem>>, vector<8x128xf32>
    %c0_7 = arith.constant 0 : index
    %c0_8 = arith.constant 0 : index
    %10 = vector.load %arg5[%c0_7, %c0_8] : memref<8x128xf32, #tpu.memory_space<vmem>>, vector<8x128xf32>
    %cst_9 = arith.constant 0.000000e+00 : f32
    %11 = vector.broadcast %cst_9 : f32 to vector<8x128xf32>
    %12 = arith.maximumf %9, %11 : vector<8x128xf32>
    %13 = arith.addf %10, %12 : vector<8x128xf32>
    %c0_10 = arith.constant 0 : index
    %c0_11 = arith.constant 0 : index
    %14 = vector.load %arg5[%c0_10, %c0_11] : memref<8x128xf32, #tpu.memory_space<vmem>>, vector<8x128xf32>
    tpu.vector_store %arg5[%c0_10, %c0_11], %13 {strides = array<i32>} : memref<8x128xf32, #tpu.memory_space<vmem>>, vector<8x128xf32>,
    %c0_i32_12 = arith.constant 0 : i32
    %15 = arith.cmpi eq, %arg2, %c0_i32_12 : i32
    %16 = arith.extui %15 : i1 to i32
    %c0_i32_13 = arith.constant 0 : i32
    %17 = arith.cmpi ne, %16, %c0_i32_13 : i32
    scf.if %17 {
      %c0_14 = arith.constant 0 : index
      %c0_15 = arith.constant 0 : index
      %18 = vector.load %arg5[%c0_14, %c0_15] : memref<8x128xf32, #tpu.memory_space<vmem>>, vector<8x128xf32>
      %cst_16 = arith.constant dense<0.000000e+00> : vector<8xf32>
      %19 = vector.multi_reduction <add>, %18, %cst_16 [1] : vector<8x128xf32> to vector<8xf32>
      %20 = vector.shape_cast %19 : vector<8xf32> to vector<8x1xf32>
      %cst_17 = arith.constant 3.906250e-03 : f32
      %21 = vector.broadcast %cst_17 : f32 to vector<8x1xf32>
      %22 = arith.mulf %20, %21 : vector<8x1xf32>
      %c0_18 = arith.constant 0 : index
      %c0_19 = arith.constant 0 : index
      %c0_20 = arith.constant 0 : index
      %23 = vector.load %arg4[%c0_18, %c0_19, %c0_20] : memref<1x8x1xf32, #tpu.memory_space<vmem>>, vector<1x8x1xf32>
      %24 = vector.shape_cast %23 : vector<1x8x1xf32> to vector<8x1xf32>
      %25 = vector.shape_cast %22 : vector<8x1xf32> to vector<1x8x1xf32>
      tpu.vector_store %arg4[%c0_18, %c0_19, %c0_20], %25 {strides = array<i32>} : memref<1x8x1xf32, #tpu.memory_space<vmem>>, vector<1x8x1xf32>,
    } else {
    }
    return
  }
  func.func @transform_0(%arg0: i32, %arg1: i32, %arg2: i32) -> (i32, i32) {
    %c1_i32 = arith.constant 1 : i32
    %0 = arith.muli %arg0, %c1_i32 : i32
    %1 = arith.addi %0, %arg2 : i32
    %c0_i32 = arith.constant 0 : i32
    return %arg1, %1 : i32, i32
  }
  func.func @transform_1(%arg0: i32, %arg1: i32, %arg2: i32) -> (i32, i32, i32) {
    %c0_i32 = arith.constant 0 : i32
    %c0_i32_0 = arith.constant 0 : i32
    return %arg0, %arg1, %c0_i32 : i32, i32, i32
  }
}

</mosaic_0001>

<bundles_post_ra>
// kernel: layer1_forward.1
= control target key start
LH: loop header
LB: loop body
LE: loop exit
PB: predicated region body
PF: predicated region fallthrough
CT: control target
= control target key end

     0   :  { %vm52_vm0 = vcmask 7168   ;;  %s83_s0 = inlined_call_operand.vmem [shape: f32[8,256], index: 0, kind: input, shape index: {}]   ;;  %s84_s1 = inlined_call_operand.vmem [shape: f32[1,8,1], index: 1, kind: output, shape index: {}]  }
   0x1   :  { %v35_v0 = vld [vmem:[%s83_s0] sm:$0xff]  ;;  %v40_v1 = vld [vmem:[%s83_s0 + $0x8] sm:$0xff] }
   0x2   :  { %v37_v2 = vmax.f32 %v35_v0, 0.0  ;;  %v42_v3 = vmax.f32 %v40_v1, 0.0 }
   0x4   :  { %v43_v4 = vadd.f32 %v42_v3, %v37_v2 }
   0x6   :  { %49 = vadd.xlane.f32.xlu0 %v43_v4 }
  0x79   :  { %v50_v5 = vpop.xlane.xlu0 %49 }
  0x7a   :  { %v51_v6 = vmul.f32 0.00390625, %v50_v5 }
  0x7c   :  { %53 = vst.msk [vmem:[%s84_s1] sm:$0xff] %vm52_vm0, %v51_v6 }

</bundles_post_ra>
